<compile_context>
chip_gen: v7x
topology: tpu7x:2x2x1
jax: 0.10.0
libtpu: 0.0.40
codegen_flags: <defaults>
</compile_context>

<pallas_src>
import functools

import jax
import jax.numpy as jnp
from jax.experimental import pallas as pl
from jax.experimental.pallas import tpu as pltpu


def _round_up(x, m):
    return ((x + m - 1) // m) * m


def _backbone_kernel(patches_ref, wconv_ref, wfc_ref, bfc_ref, out_ref, acc_ref,
                     *, hw, tile_p, cout_p):
    # patches: [1, TILE_P, KP] bf16   wconv: [KP, CoutP]  bf16
    # wfc:     [CoutP, NCP]    bf16   bfc:   [1, NCP]     f32
    # out:     [1, 1, NCP]     f32    acc:   [8, CoutP]   f32 (resident pooled sum)
    p = pl.program_id(1)

    @pl.when(p == 0)
    def _init():
        acc_ref[...] = jnp.zeros_like(acc_ref)

    # Conv as one contiguous 2-D im2col matmul on the MXU (bf16 in, f32 accum).
    feat = jnp.dot(patches_ref[0], wconv_ref[...],
                   preferred_element_type=jnp.float32)          # [TILE_P, CoutP]
    # ReLU stays in f32 on the VPU (no bf16 elementwise on v5e).
    feat = jnp.maximum(feat, 0.0)

    # Partial global-average-pool sum on the VPU: fold TILE_P rows onto 8
    # sublanes with vreg-wise adds (no MXU weight push, no XLU reduce here).
    acc_ref[...] += feat.reshape(tile_p // 8, 8, cout_p).sum(axis=0)

    @pl.when(p == pl.num_programs(1) - 1)
    def _finalize():
        # Single small cross-sublane reduce, then classifier matmul + bias.
        pooled = jnp.sum(acc_ref[...], axis=0, keepdims=True) * (1.0 / hw)  # [1, CoutP]
        logits = jnp.dot(pooled.astype(jnp.bfloat16), wfc_ref[...],
                         preferred_element_type=jnp.float32) + bfc_ref[...]
        out_ref[...] = logits[None].astype(out_ref.dtype)       # [1, 1, NCP]


def continual_model_forward(x_nchw, wconv_pt, wfc, bfc, *, max_tile_p=2048):
    """Forward pass of ContinualModel (== backbone forward).

    x_nchw:   [B, Cin, H, W]  float32 (PyTorch NCHW convention)
    wconv_pt: [Cout, Cin, 3, 3]  (PyTorch Conv2d weight layout)
    wfc:      [Cout, NC]
    bfc:      [NC]
    returns:  [B, NC] logits (float32)
    """
    B, Cin, H, W = x_nchw.shape
    Cout = wconv_pt.shape[0]
    NC = wfc.shape[1]
    kh = kw = 3
    K = Cin * kh * kw
    HW = H * W

    KP = _round_up(K, 32)            # pad contraction dim 27 -> 32
    CoutP = _round_up(Cout, 128)     # pad conv-out dim 32 -> 128 (lane-dense)
    NCP = _round_up(NC, 128)         # pad class dim 10 -> 128 (lane-dense stores)

    # Collapse the spatial grid: one step per image whenever HW fits the tile
    # budget.  Remainder rows are zero-padded patches (contribute exactly zero).
    tile_p = min(max_tile_p, _round_up(HW, 8))
    n_p = -(-HW // tile_p)
    HWP = n_p * tile_p

    # ---- glue: bf16 MXU operands + fused patch extraction ----
    x_bf16 = x_nchw.astype(jnp.bfloat16)
    # [B, K, H, W], feature order (Cin major, (kh, kw) minor).
    patches = jax.lax.conv_general_dilated_patches(
        x_bf16, filter_shape=(kh, kw), window_strides=(1, 1), padding="SAME")
    patches = jnp.transpose(patches, (0, 2, 3, 1)).reshape(B, HW, K)
    patches = jnp.pad(patches,
                      ((0, 0), (0, HWP - HW), (0, KP - K)))      # [B, HWP, KP]

    # Conv weight -> matmul layout matching the patch feature order (Cin, kh, kw).
    wconv = jnp.transpose(wconv_pt, (1, 2, 3, 0)).reshape(K, Cout)
    wconv = jnp.pad(wconv, ((0, KP - K), (0, CoutP - Cout))).astype(jnp.bfloat16)

    wfc_p = jnp.pad(wfc, ((0, CoutP - Cout), (0, NCP - NC))).astype(jnp.bfloat16)
    bfc_p = jnp.pad(bfc.astype(jnp.float32), ((0, NCP - NC),)).reshape(1, NCP)

    kernel = functools.partial(_backbone_kernel, hw=HW, tile_p=tile_p,
                               cout_p=CoutP)

    flops = (2 * B * HWP * KP * CoutP       # conv matmul
             + 2 * B * HWP * CoutP          # relu + pooled adds
             + 2 * B * CoutP * NCP)         # classifier
    bytes_accessed = (B * HWP * KP * 2 + KP * CoutP * 2
                      + CoutP * NCP * 2 + NCP * 4 + B * NCP * 4)

    out = pl.pallas_call(
        kernel,
        out_shape=jax.ShapeDtypeStruct((B, 1, NCP), jnp.float32),
        grid_spec=pltpu.PrefetchScalarGridSpec(
            num_scalar_prefetch=0,
            grid=(B, n_p),
            in_specs=[
                pl.BlockSpec((1, tile_p, KP), lambda b, p: (b, p, 0)),
                # Constant-index weight blocks (could be single-buffered via
                # pipeline_mode=pl.Buffered(1); default kept for portability).
                pl.BlockSpec((KP, CoutP), lambda b, p: (0, 0)),
                pl.BlockSpec((CoutP, NCP), lambda b, p: (0, 0)),
                pl.BlockSpec((1, NCP), lambda b, p: (0, 0)),
            ],
            out_specs=pl.BlockSpec((1, 1, NCP), lambda b, p: (b, 0, 0)),
            scratch_shapes=[pltpu.VMEM((8, CoutP), jnp.float32)],
        ),
        compiler_params=pltpu.CompilerParams(
            dimension_semantics=("parallel", "arbitrary"),
            vmem_limit_bytes=32 * 1024 * 1024,
        ),
        cost_estimate=pl.CostEstimate(
            flops=flops, transcendentals=0, bytes_accessed=bytes_accessed),
    )(patches, wconv, wfc_p, bfc_p)

    return out.reshape(B, NCP)[:, :NC]


if __name__ == "__main__":
    key = jax.random.PRNGKey(0)
    k_x, k_wc, k_wf, k_bf = jax.random.split(key, 4)

    B, Cin, H, W = 2, 3, 16, 16
    Cout, NC = 32, 10

    x = jax.random.normal(k_x, (B, Cin, H, W), dtype=jnp.float32)
    wconv_pt = jax.random.normal(k_wc, (Cout, Cin, 3, 3), dtype=jnp.float32) * 0.1
    wfc = jax.random.normal(k_wf, (Cout, NC), dtype=jnp.float32) * 0.1
    bfc = jax.random.normal(k_bf, (NC,), dtype=jnp.float32) * 0.1

    out = jax.jit(continual_model_forward)(x, wconv_pt, wfc, bfc)
    jax.block_until_ready(out)

    # Pure-JAX f32 reference (conv -> relu -> GAP -> linear); tolerance covers
    # the bf16 operands used inside the kernel.
    ref = jax.lax.conv_general_dilated(
        x, wconv_pt, window_strides=(1, 1), padding="SAME",
        dimension_numbers=("NCHW", "OIHW", "NCHW"))
    ref = jnp.maximum(ref, 0.0).mean(axis=(2, 3)) @ wfc + bfc
    max_err = float(jnp.max(jnp.abs(out - ref)))
    assert jnp.allclose(out, ref, atol=2e-2, rtol=2e-2), \
        f"mismatch vs reference (max abs err {max_err})"

    # TODO(synk): observe()/SGD optimizer/checkpoint-loading/dataset paths are
    # training & IO logic with no Pallas forward-pass equivalent; only forward
    # is implemented.
    print("KERNEL_OK")
</pallas_src>

<mosaic_0001>
module attributes {stable_mosaic.version = 11 : i64} {
  func.func @_backbone_kernel(%arg0: i32, %arg1: i32, %arg2: memref<1x256x32xbf16, #tpu.memory_space<vmem>>, %arg3: memref<32x128xbf16, #tpu.memory_space<vmem>>, %arg4: memref<128x128xbf16, #tpu.memory_space<vmem>>, %arg5: memref<1x128xf32, #tpu.memory_space<vmem>>, %arg6: memref<1x1x128xf32, #tpu.memory_space<vmem>>, %arg7: memref<8x128xf32, #tpu.memory_space<vmem>>) attributes {dimension_semantics = [#tpu.dimension_semantics<parallel>, #tpu.dimension_semantics<arbitrary>], iteration_bounds = array<i64: 2, 1>, scalar_prefetch = 0 : i64, scratch_operands = 1 : i64, tpu.core_type = #tpu.core_type<tc>, window_params = [{transform_indices = @transform_0, window_bounds = array<i64: 1, 256, 32>}, {pipeline_mode = #tpu.pipeline_mode<synchronous>, transform_indices = @transform_1, window_bounds = array<i64: 32, 128>}, {pipeline_mode = #tpu.pipeline_mode<synchronous>, transform_indices = @transform_2, window_bounds = array<i64: 128, 128>}, {pipeline_mode = #tpu.pipeline_mode<synchronous>, transform_indices = @transform_3, window_bounds = array<i64: 1, 128>}, {transform_indices = @transform_4, window_bounds = array<i64: 1, 1, 128>}]} {
    %c0_i32 = arith.constant 0 : i32
    %0 = arith.cmpi eq, %arg1, %c0_i32 : i32
    %1 = arith.extui %0 : i1 to i32
    %c0_i32_0 = arith.constant 0 : i32
    %2 = arith.cmpi ne, %1, %c0_i32_0 : i32
    scf.if %2 {
      %cst_13 = arith.constant 0.000000e+00 : f32
      %17 = vector.broadcast %cst_13 : f32 to vector<8x128xf32>
      %c0_14 = arith.constant 0 : index
      %c0_15 = arith.constant 0 : index
      %18 = vector.load %arg7[%c0_14, %c0_15] : memref<8x128xf32, #tpu.memory_space<vmem>>, vector<8x128xf32>
      tpu.vector_store %arg7[%c0_14, %c0_15], %17 {strides = array<i32>} : memref<8x128xf32, #tpu.memory_space<vmem>>, vector<8x128xf32>,
    } else {
    }
    %c0 = arith.constant 0 : index
    %c0_1 = arith.constant 0 : index
    %c0_2 = arith.constant 0 : index
    %3 = vector.load %arg2[%c0, %c0_1, %c0_2] : memref<1x256x32xbf16, #tpu.memory_space<vmem>>, vector<1x256x32xbf16>
    %4 = vector.shape_cast %3 : vector<1x256x32xbf16> to vector<256x32xbf16>
    %c0_3 = arith.constant 0 : index
    %c0_4 = arith.constant 0 : index
    %5 = vector.load %arg3[%c0_3, %c0_4] : memref<32x128xbf16, #tpu.memory_space<vmem>>, vector<32x128xbf16>
    %cst = arith.constant dense<0.000000e+00> : vector<256x128xf32>
    %6 = tpu.matmul %4, %5, %cst {dimension_numbers = #tpu.dot_dimension_numbers<[1], [0], [0], [1], [0, 0, 1, 1], [], []>} : vector<256x32xbf16>, vector<32x128xbf16>, vector<256x128xf32> -> vector<256x128xf32>
    %cst_5 = arith.constant 0.000000e+00 : f32
    %7 = vector.broadcast %cst_5 : f32 to vector<256x128xf32>
    %8 = arith.maximumf %6, %7 : vector<256x128xf32>
    %c0_6 = arith.constant 0 : index
    %c0_7 = arith.constant 0 : index
    %9 = vector.load %arg7[%c0_6, %c0_7] : memref<8x128xf32, #tpu.memory_space<vmem>>, vector<8x128xf32>
    %10 = vector.shape_cast %8 : vector<256x128xf32> to vector<32x8x128xf32>
    %cst_8 = arith.constant dense<0.000000e+00> : vector<8x128xf32>
    %11 = vector.multi_reduction <add>, %10, %cst_8 [0] : vector<32x8x128xf32> to vector<8x128xf32>
    %12 = arith.addf %9, %11 : vector<8x128xf32>
    %c0_9 = arith.constant 0 : index
    %c0_10 = arith.constant 0 : index
    %13 = vector.load %arg7[%c0_9, %c0_10] : memref<8x128xf32, #tpu.memory_space<vmem>>, vector<8x128xf32>
    tpu.vector_store %arg7[%c0_9, %c0_10], %12 {strides = array<i32>} : memref<8x128xf32, #tpu.memory_space<vmem>>, vector<8x128xf32>,
    %c0_i32_11 = arith.constant 0 : i32
    %14 = arith.cmpi eq, %arg1, %c0_i32_11 : i32
    %15 = arith.extui %14 : i1 to i32
    %c0_i32_12 = arith.constant 0 : i32
    %16 = arith.cmpi ne, %15, %c0_i32_12 : i32
    scf.if %16 {
      %c0_13 = arith.constant 0 : index
      %c0_14 = arith.constant 0 : index
      %17 = vector.load %arg7[%c0_13, %c0_14] : memref<8x128xf32, #tpu.memory_space<vmem>>, vector<8x128xf32>
      %cst_15 = arith.constant dense<0.000000e+00> : vector<128xf32>
      %18 = vector.multi_reduction <add>, %17, %cst_15 [0] : vector<8x128xf32> to vector<128xf32>
      %19 = vector.shape_cast %18 : vector<128xf32> to vector<1x128xf32>
      %cst_16 = arith.constant 3.906250e-03 : f32
      %20 = vector.broadcast %cst_16 : f32 to vector<1x128xf32>
      %21 = arith.mulf %19, %20 : vector<1x128xf32>
      %22 = arith.truncf %21 : vector<1x128xf32> to vector<1x128xbf16>
      %c0_17 = arith.constant 0 : index
      %c0_18 = arith.constant 0 : index
      %23 = vector.load %arg4[%c0_17, %c0_18] : memref<128x128xbf16, #tpu.memory_space<vmem>>, vector<128x128xbf16>
      %cst_19 = arith.constant dense<0.000000e+00> : vector<1x128xf32>
      %24 = tpu.matmul %22, %23, %cst_19 {dimension_numbers = #tpu.dot_dimension_numbers<[1], [0], [0], [1], [0, 0, 1, 1], [], []>} : vector<1x128xbf16>, vector<128x128xbf16>, vector<1x128xf32> -> vector<1x128xf32>
      %c0_20 = arith.constant 0 : index
      %c0_21 = arith.constant 0 : index
      %25 = vector.load %arg5[%c0_20, %c0_21] : memref<1x128xf32, #tpu.memory_space<vmem>>, vector<1x128xf32>
      %26 = arith.addf %24, %25 : vector<1x128xf32>
      %27 = vector.shape_cast %26 : vector<1x128xf32> to vector<1x1x128xf32>
      %c0_22 = arith.constant 0 : index
      %c0_23 = arith.constant 0 : index
      %c0_24 = arith.constant 0 : index
      %28 = vector.load %arg6[%c0_22, %c0_23, %c0_24] : memref<1x1x128xf32, #tpu.memory_space<vmem>>, vector<1x1x128xf32>
      tpu.vector_store %arg6[%c0_22, %c0_23, %c0_24], %27 {strides = array<i32>} : memref<1x1x128xf32, #tpu.memory_space<vmem>>, vector<1x1x128xf32>,
    } else {
    }
    return
  }
  func.func @transform_0(%arg0: i32, %arg1: i32) -> (i32, i32, i32) {
    %c0_i32 = arith.constant 0 : i32
    %c0_i32_0 = arith.constant 0 : i32
    return %arg0, %arg1, %c0_i32 : i32, i32, i32
  }
  func.func @transform_1(%arg0: i32, %arg1: i32) -> (i32, i32) {
    %c0_i32 = arith.constant 0 : i32
    %c0_i32_0 = arith.constant 0 : i32
    %c0_i32_1 = arith.constant 0 : i32
    return %c0_i32, %c0_i32_0 : i32, i32
  }
  func.func @transform_2(%arg0: i32, %arg1: i32) -> (i32, i32) {
    %c0_i32 = arith.constant 0 : i32
    %c0_i32_0 = arith.constant 0 : i32
    %c0_i32_1 = arith.constant 0 : i32
    return %c0_i32, %c0_i32_0 : i32, i32
  }
  func.func @transform_3(%arg0: i32, %arg1: i32) -> (i32, i32) {
    %c0_i32 = arith.constant 0 : i32
    %c0_i32_0 = arith.constant 0 : i32
    %c0_i32_1 = arith.constant 0 : i32
    return %c0_i32, %c0_i32_0 : i32, i32
  }
  func.func @transform_4(%arg0: i32, %arg1: i32) -> (i32, i32, i32) {
    %c0_i32 = arith.constant 0 : i32
    %c0_i32_0 = arith.constant 0 : i32
    %c0_i32_1 = arith.constant 0 : i32
    return %arg0, %c0_i32, %c0_i32_0 : i32, i32, i32
  }
}

</mosaic_0001>

<bundles_post_ra>
// kernel: continual_model_forward.1
= control target key start
LH: loop header
LB: loop body
LE: loop exit
PB: predicated region body
PF: predicated region fallthrough
CT: control target
= control target key end

     0   :  { %9 = vsyncpa [#allocation4], 0  ;;  %s1339_s0 = inlined_call_operand.vmem [shape: bf16[2,256,32], index: 0, kind: input, shape index: {}]   ;;  %s1340_s1 = inlined_call_operand.vmem [shape: bf16[32,128], index: 1, kind: input, shape index: {}]   ;;  %s1341_s2 = inlined_call_operand.vmem [shape: bf16[128,128], index: 2, kind: input, shape index: {}]   ;;  %s1342_s3 = inlined_call_operand.vmem [shape: f32[1,128], index: 3, kind: input, shape index: {}]   ;;  %s1343_s4 = inlined_call_operand.hbm [shape: f32[2,1,128], index: 4, kind: output, shape index: {}]  }
   0x1   :  { %11 = vsyncpa [#allocation4 + $0x1], 0  ;;  %s1160_s15 = smov 0   ;;  %s1162_s16 = smov 0  }
   0x2   :  { %s1164_s17 = smov 0   ;;  %s1166_s18 = smov 0  }
   0x3   :  { %s1168_s19 = smov 0   ;;  %s1170_s20 = smov 0  }
   0x4 LB: > { %s833_s21 = sadd.s32 4294967295, %s1130_s20   ;;  %s834_s22 = sadd.s32 4294967294, %s1130_s20   ;;  %s1130_s20 = sphi %s1170_s20, %s17_s20   ;;  %s1126_s19 = sphi %s1168_s19, %s1350_s19   ;;  %s1122_s18 = sphi %s1166_s18, %s1349_s18   ;;  %s1118_s17 = sphi %s1164_s17, %s1348_s17   ;;  %s1114_s16 = sphi %s1162_s16, %s1347_s16   ;;  %s1110_s15 = sphi %s1160_s15, %s1346_s15  }
   0x5   : > { %s29_s23 = sadd.s32 1, %s1126_s19  ;;  %s127_s24 = sadd.s32 1, %s1118_s17 }
   0x6   : > { %p31_p0 = scmp.ge.s32.totalorder %s29_s23, 2  ;;  %p137_p1 = scmp.ne.s32.totalorder %s1118_s17, %s1114_s16 }
   0x7   : > { %p138_p2 = scmp.eq.s32.totalorder %s833_s21, 1  ;;  %p143_p3 = scmp.ne.s32.totalorder %s1114_s16, %s1110_s15 }
   0x8   : > { %s1352_s23 = smov (%p31_p0, %s29_s23), 0  ;;  %p144_p5 = scmp.eq.s32.totalorder %s834_s22, 1 }
   0x9   : > { %p1200_p4 = por %p138_p2, %p137_p1  ;;  %s124_s26 = ssub.s32 %s1126_s19, %s1352_s23 }
   0xa   : > { %p837_p6 = scmp.ge.s32.totalorder %s1130_s20, 1  ;;  %p125_p7 = scmp.eq.s32.totalorder %s124_s26, 0 }
   0xb   : > { %p1207_p8 = por %p144_p5, %p143_p3  ;;  %p184_p9 = scmp.lt.s32.totalorder %s1130_s20, 3 }
   0xc   : > { %s1213_s28 = scalar_select %p125_p7, %s1118_s17, %s127_s24  }
   0xd   : > { %p185_p10 = pnand %p837_p6, %p184_p9 }
   0xe   : > { %v1026_v0 = vld [vmem:[%s1340_s1] sm:$0xff] (!%p185_p10)   ;;  %p214_p11 = scmp.lt.s32.totalorder (!%p185_p10), %s1122_s18, 1  ;;  %v1027_v1 = vld [vmem:[%s1340_s1 + $0x8] sm:$0xff] (!%p185_p10)   ;;  %vm357_vm0 = vcmask (!%p185_p10), 261120   ;;  %v1132_v19 = vmov (!%p185_p10), 0.0   ;;  %v1046_v21 = vld [vmem:[%s1341_s2 + $0x10] sm:$0xff] (!%p185_p10)  }
   0xf   : > { %188 = sbr.rel (%p185_p10) target bundleno = 551 (0x227), region = 36  ;;  %913 = vmatprep.subr.bf16.mxu0 (!%p185_p10), %v1026_v0  ;;  %v1044_v18 = vld [vmem:[%s1341_s2] sm:$0xff] (!%p185_p10)   ;;  %949 = vmatprep.subr.bf16.mxu1 (!%p185_p10), %v1132_v19  ;;  %v1045_v20 = vld [vmem:[%s1341_s2 + $0x8] sm:$0xff] (!%p185_p10)   ;;  %v1047_v22 = vld [vmem:[%s1341_s2 + $0x18] sm:$0xff] (!%p185_p10)   ;;  %vm1133_vm1 = vmmov (!%p185_p10), 0   ;;  %s211_s12 = sand.u32 (!%p185_p10), 1, %s1114_s16  }
  0x10   : > { %914 = vmatpush3.bf16.msra.mxu0 (!%p185_p10), %v1026_v0  ;;  %950 = vmatpush3.bf16.msra.mxu1 (!%p185_p10), %v1044_v18  ;;  %v1048_v23 = vld [vmem:[%s1341_s2 + $0x20] sm:$0xff] (!%p185_p10)   ;;  %v1049_v24 = vld [vmem:[%s1341_s2 + $0x28] sm:$0xff] (!%p185_p10)   ;;  %v1050_v25 = vld [vmem:[%s1341_s2 + $0x30] sm:$0xff] (!%p185_p10)   ;;  %s882_s21 = sshll.u32 (!%p185_p10), %s1122_s18, 4  ;;  %s212_s22 = scalar_lea.vmem (!%p185_p10), [#allocation3], %s211_s12 }
  0x11   : > { %915 = vmatprep.subr.bf16.mxu0 (!%p185_p10), %v1027_v1  ;;  %951 = vmatprep.subr.bf16.mxu1 (!%p185_p10), %v1132_v19  ;;  %v1051_v26 = vld [vmem:[%s1341_s2 + $0x38] sm:$0xff] (!%p185_p10)   ;;  %s764_s24 = sshll.u32 (!%p185_p10), %s212_s22, 4  ;;  %s1292_s30 = scalar_lea.hbm (!%p185_p10), %s1343_s4, %s882_s21  ;;  %s1294_s24 = int_to_ptr.vmem [resolvable:$true] %s764_s24 }
  0x12   : > { %965 = vmatprep.mubr.msk.bf16.mxu1 (!%p185_p10), %vm1133_vm1, %v1132_v19  ;;  %s752_s5 = scalar_lea.sflag (!%p185_p10), [#allocation4], %s211_s12  ;;  %s1134_s6 = smov (!%p185_p10), [#allocation3]  }
  0x14   : > { %916 = vmatpush3.bf16.msra.mxu0 (!%p185_p10), %v1027_v1  ;;  %952 = vmatpush3.bf16.msra.mxu1 (!%p185_p10), %v1045_v20 }
  0x15   : > { %953 = vmatprep.subr.bf16.mxu1 (!%p185_p10), %v1132_v19 }
  0x16   : > { %s215_s7 = scalar_select %p214_p11, %s1122_s18, 1 }
  0x17   : > { %s1052_s18 = scalar_lea.vmem %s1294_s24, 16 }
  0x18   : > { %s885_s8 = sshll.u32 %s215_s7, 7  ;;  %954 = vmatpush3.bf16.msra.mxu1 %v1046_v21  ;;  %p1053_p12 = scmp.ne.s32.totalorder %s1294_s24, %s1052_s18 }
  0x19   : > { %s1226_s11 = scalar_lea.vmem %s1339_s0, %s885_s8  ;;  %955 = vmatprep.subr.bf16.mxu1 %v1132_v19  ;;  %s1056_s7 = sshll.u32 %s1134_s6, 4  ;;  %s1057_s7 = int_to_ptr.vmem [resolvable:$false] %s1056_s7 }
  0x1a   : > { %v1028_v2 = vld [vmem:[%s1226_s11] sm:$0xff]   ;;  %v1029_v3 = vld [vmem:[%s1226_s11 + $0x8] sm:$0xff]   ;;  %v1030_v4 = vld [vmem:[%s1226_s11 + $0x10] sm:$0xff]   ;;  %p1054_p13 = pnand %p1053_p12, %p1200_p4  ;;  %s1058_s8 = scalar_lea.vmem %s1057_s7, 32 }
  0x1b   : > { %917 = vmatprep.mubr.msk.bf16.mxu0 %vm357_vm0, %v1028_v2  ;;  %v1031_v5 = vld [vmem:[%s1226_s11 + $0x18] sm:$0xff]   ;;  %v1032_v6 = vld [vmem:[%s1226_s11 + $0x20] sm:$0xff]   ;;  %v1033_v7 = vld [vmem:[%s1226_s11 + $0x28] sm:$0xff]   ;;  %p1059_p1 = scmp.lt.s32.totalorder %s1294_s24, %s1057_s7  ;;  %p1060_p2 = scmp.lt.s32.totalorder %s1058_s8, %s1052_s18 }
  0x1c   : > { %918 = vmatmul.mubr.msk.bf16.vlgmr.msra.gmra.mrb[0].mxu0 %vm357_vm0, %v1029_v3  ;;  %v1034_v8 = vld [vmem:[%s1226_s11 + $0x30] sm:$0xff]   ;;  %v1035_v9 = vld [vmem:[%s1226_s11 + $0x38] sm:$0xff]   ;;  %v1036_v10 = vld [vmem:[%s1226_s11 + $0x40] sm:$0xff]   ;;  %956 = vmatpush3.bf16.msra.mxu1 %v1047_v22  ;;  %p1055_p0 = pneg %p1054_p13 }
  0x1d   : > { %921 = vmatprep.mubr.msk.bf16.mxu0 %vm357_vm0, %v1030_v4  ;;  %v1037_v11 = vld [vmem:[%s1226_s11 + $0x48] sm:$0xff]   ;;  %v1038_v12 = vld [vmem:[%s1226_s11 + $0x50] sm:$0xff]   ;;  %v1039_v13 = vld [vmem:[%s1226_s11 + $0x58] sm:$0xff]   ;;  %957 = vmatprep.subr.bf16.mxu1 %v1132_v19  ;;  %p1061_p3 = por %p1060_p2, %p1059_p1 }
  0x1e   : > { %v1040_v14 = vld [vmem:[%s1226_s11 + $0x60] sm:$0xff]   ;;  %v1041_v15 = vld [vmem:[%s1226_s11 + $0x68] sm:$0xff]   ;;  %v1042_v16 = vld [vmem:[%s1226_s11 + $0x70] sm:$0xff]  }
  0x1f   : > { %v1043_v17 = vld [vmem:[%s1226_s11 + $0x78] sm:$0xff]   ;;  %p1062_p5 = pnand %p1061_p3, %p1055_p0 }
  0x20   : > { %958 = vmatpush3.bf16.msra.mxu1 %v1048_v23 }
  0x21   : > { %959 = vmatprep.subr.bf16.mxu1 %v1132_v19 }
  0x24   : > { %922 = vmatmul.mubr.msk.bf16.gmra.mrb[4].mxu0 %vm357_vm0, %v1031_v5  ;;  %960 = vmatpush3.bf16.msra.mxu1 %v1049_v24 }
  0x25   : > { %925 = vmatprep.mubr.msk.bf16.mxu0 %vm357_vm0, %v1032_v6  ;;  %961 = vmatprep.subr.bf16.mxu1 %v1132_v19 }
  0x28   : > { %962 = vmatpush3.bf16.msra.mxu1 %v1050_v25 }
  0x29   : > { %963 = vmatprep.subr.bf16.mxu1 %v1132_v19 }
  0x2c   : > { %926 = vmatmul.mubr.msk.bf16.gmra.mrb[8].mxu0 %vm357_vm0, %v1033_v7  ;;  %964 = vmatpush3.bf16.msra.mxu1 %v1051_v26 }
  0x2d   : > { %929 = vmatprep.mubr.msk.bf16.mxu0 %vm357_vm0, %v1034_v8 }
  0x34   : > { %930 = vmatmul.mubr.msk.bf16.gmra.mrb[12].mxu0 %vm357_vm0, %v1035_v9 }
  0x35   : > { %933 = vmatprep.mubr.msk.bf16.mxu0 %vm357_vm0, %v1036_v10 }
  0x3c   : > { %934 = vmatmul.mubr.msk.bf16.gmra.mrb[16].mxu0 %vm357_vm0, %v1037_v11 }
  0x3d   : > { %937 = vmatprep.mubr.msk.bf16.mxu0 %vm357_vm0, %v1038_v12 }
  0x44   : > { %938 = vmatmul.mubr.msk.bf16.gmra.mrb[20].mxu0 %vm357_vm0, %v1039_v13 }
  0x45   : > { %941 = vmatprep.mubr.msk.bf16.mxu0 %vm357_vm0, %v1040_v14 }
  0x4c   : > { %942 = vmatmul.mubr.msk.bf16.gmra.mrb[24].mxu0 %vm357_vm0, %v1041_v15 }
  0x4d   : > { %945 = vmatprep.mubr.msk.bf16.mxu0 %vm357_vm0, %v1042_v16 }
  0x54   : > { %946 = vmatmul.mubr.msk.bf16.gmra.mrb[28].mxu0 %vm357_vm0, %v1043_v17 }
  0xef   : > { %v919_v27 = vpop.f32.mrb[0].mxu0 }
  0xf0   : > { %v440_v28 = vpop.f32.mrb[1].mxu0  ;;  %v569_v33 = vmax.f32 %v919_v27, 0.0 }
  0xf1   : > { %v920_v29 = vpop.f32.mrb[2].mxu0  ;;  %v567_v31 = vmax.f32 %v440_v28, 0.0 }
  0xf2   : > { %v443_v30 = vpop.f32.mrb[3].mxu0  ;;  %v570_v35 = vmax.f32 %v920_v29, 0.0 }
  0xf3   : > { %v568_v32 = vmax.f32 %v443_v30, 0.0 }
  0xf5   : > { %v600_v34 = vadd.f32 %v568_v32, %v567_v31 }
  0xf7   : > { %v601_v36 = vadd.f32 %v600_v34, %v569_v33  ;;  %v923_v37 = vpop.f32.mrb[4].mxu0 }
  0xf8   : > { %v456_v38 = vpop.f32.mrb[5].mxu0  ;;  %v573_v45 = vmax.f32 %v923_v37, 0.0 }
  0xf9   : > { %v571_v39 = vmax.f32 %v456_v38, 0.0  ;;  %v602_v40 = vadd.f32 %v601_v36, %v570_v35  ;;  %v924_v41 = vpop.f32.mrb[6].mxu0 }
  0xfa   : > { %v459_v42 = vpop.f32.mrb[7].mxu0  ;;  %v574_v47 = vmax.f32 %v924_v41, 0.0 }
  0xfb   : > { %v603_v43 = vadd.f32 %v602_v40, %v571_v39  ;;  %v572_v44 = vmax.f32 %v459_v42, 0.0 }
  0xfd   : > { %v604_v46 = vadd.f32 %v603_v43, %v572_v44 }
  0xff   : > { %v605_v48 = vadd.f32 %v604_v46, %v573_v45  ;;  %v927_v49 = vpop.f32.mrb[8].mxu0 }
 0x100   : > { %v472_v50 = vpop.f32.mrb[9].mxu0  ;;  %v577_v57 = vmax.f32 %v927_v49, 0.0 }
 0x101   : > { %v575_v51 = vmax.f32 %v472_v50, 0.0  ;;  %v606_v52 = vadd.f32 %v605_v48, %v574_v47  ;;  %v928_v53 = vpop.f32.mrb[10].mxu0 }
 0x102   : > { %v475_v54 = vpop.f32.mrb[11].mxu0  ;;  %v578_v59 = vmax.f32 %v928_v53, 0.0 }
 0x103   : > { %v607_v55 = vadd.f32 %v606_v52, %v575_v51  ;;  %v576_v56 = vmax.f32 %v475_v54, 0.0 }
 0x105   : > { %v608_v58 = vadd.f32 %v607_v55, %v576_v56 }
 0x107   : > { %v609_v60 = vadd.f32 %v608_v58, %v577_v57  ;;  %v931_v61 = vpop.f32.mrb[12].mxu0 }
 0x108   : > { %v488_v62 = vpop.f32.mrb[13].mxu0  ;;  %v581_v5 = vmax.f32 %v931_v61, 0.0 }
 0x109   : > { %v579_v63 = vmax.f32 %v488_v62, 0.0  ;;  %v610_v0 = vadd.f32 %v609_v60, %v578_v59  ;;  %v932_v1 = vpop.f32.mrb[14].mxu0 }
 0x10a   : > { %v491_v2 = vpop.f32.mrb[15].mxu0  ;;  %v582_v7 = vmax.f32 %v932_v1, 0.0 }
 0x10b   : > { %v611_v3 = vadd.f32 %v610_v0, %v579_v63  ;;  %v580_v4 = vmax.f32 %v491_v2, 0.0  ;;  %v661_v2 = vld [vmem:[%s1342_s3] sm:$0x1] }
 0x10d   : > { %v612_v6 = vadd.f32 %v611_v3, %v580_v4 }
 0x10f   : > { %v613_v8 = vadd.f32 %v612_v6, %v581_v5  ;;  %v935_v9 = vpop.f32.mrb[16].mxu0 }
 0x110   : > { %v504_v10 = vpop.f32.mrb[17].mxu0  ;;  %v585_v17 = vmax.f32 %v935_v9, 0.0 }
 0x111   : > { %v583_v11 = vmax.f32 %v504_v10, 0.0  ;;  %v614_v12 = vadd.f32 %v613_v8, %v582_v7  ;;  %v936_v13 = vpop.f32.mrb[18].mxu0 }
 0x112   : > { %v507_v14 = vpop.f32.mrb[19].mxu0  ;;  %v586_v19 = vmax.f32 %v936_v13, 0.0 }
 0x113   : > { %v615_v15 = vadd.f32 %v614_v12, %v583_v11  ;;  %v584_v16 = vmax.f32 %v507_v14, 0.0 }
 0x115   : > { %v616_v18 = vadd.f32 %v615_v15, %v584_v16 }
 0x117   : > { %v617_v20 = vadd.f32 %v616_v18, %v585_v17  ;;  %v939_v21 = vpop.f32.mrb[20].mxu0 }
 0x118   : > { %v520_v22 = vpop.f32.mrb[21].mxu0  ;;  %v589_v29 = vmax.f32 %v939_v21, 0.0 }
 0x119   : > { %v587_v23 = vmax.f32 %v520_v22, 0.0  ;;  %v618_v24 = vadd.f32 %v617_v20, %v586_v19  ;;  %v940_v25 = vpop.f32.mrb[22].mxu0 }
 0x11a   : > { %v523_v26 = vpop.f32.mrb[23].mxu0  ;;  %v590_v31 = vmax.f32 %v940_v25, 0.0 }
 0x11b   : > { %v619_v27 = vadd.f32 %v618_v24, %v587_v23  ;;  %v588_v28 = vmax.f32 %v523_v26, 0.0 }
 0x11d   : > { %v620_v30 = vadd.f32 %v619_v27, %v588_v28 }
 0x11f   : > { %v621_v32 = vadd.f32 %v620_v30, %v589_v29  ;;  %v943_v33 = vpop.f32.mrb[24].mxu0 }
 0x120   : > { %v536_v34 = vpop.f32.mrb[25].mxu0  ;;  %v593_v41 = vmax.f32 %v943_v33, 0.0 }
 0x121   : > { %v591_v35 = vmax.f32 %v536_v34, 0.0  ;;  %v622_v36 = vadd.f32 %v621_v32, %v590_v31  ;;  %v944_v37 = vpop.f32.mrb[26].mxu0 }
 0x122   : > { %v539_v38 = vpop.f32.mrb[27].mxu0  ;;  %v594_v43 = vmax.f32 %v944_v37, 0.0 }
 0x123   : > { %v623_v39 = vadd.f32 %v622_v36, %v591_v35  ;;  %v592_v40 = vmax.f32 %v539_v38, 0.0 }
 0x125   : > { %v624_v42 = vadd.f32 %v623_v39, %v592_v40 }
 0x127   : > { %v625_v44 = vadd.f32 %v624_v42, %v593_v41  ;;  %v947_v45 = vpop.f32.mrb[28].mxu0 }
 0x128   : > { %v552_v46 = vpop.f32.mrb[29].mxu0  ;;  %v597_v53 = vmax.f32 %v947_v45, 0.0 }
 0x129   : > { %v595_v47 = vmax.f32 %v552_v46, 0.0  ;;  %v626_v48 = vadd.f32 %v625_v44, %v594_v43  ;;  %v948_v49 = vpop.f32.mrb[30].mxu0 }
 0x12a   : > { %v555_v50 = vpop.f32.mrb[31].mxu0  ;;  %v598_v55 = vmax.f32 %v948_v49, 0.0 }
 0x12b   : > { %v627_v51 = vadd.f32 %v626_v48, %v595_v47  ;;  %v596_v52 = vmax.f32 %v555_v50, 0.0 }
 0x12d   : > { %v628_v54 = vadd.f32 %v627_v51, %v596_v52 }
 0x12f   : > { %v629_v56 = vadd.f32 %v628_v54, %v597_v53 }
 0x131   : > { %v630_v57 = vadd.f32 %v629_v56, %v598_v55 }
 0x133   : > { %v637_v58 = vrot.slane %v630_v57, 4 }
 0x135   : > { %v638_v59 = vadd.f32 %v637_v58, %v630_v57 }
 0x137   : > { %v639_v60 = vrot.slane %v638_v59, 2 }
 0x139   : > { %v640_v61 = vadd.f32 %v639_v60, %v638_v59 }
 0x13b   : > { %v641_v62 = vrot.slane %v640_v61, 1 }
 0x13d   : > { %v642_v63 = vadd.f32 %v641_v62, %v640_v61 }
 0x13f   : > { %v643_v0 = vmul.f32 0.00390625, %v642_v63 }
 0x141   : > { %v644_v1 = vpack.c.bf16 %v643_v0, %v643_v0 }
 0x143   : > { %966 = vmatmul.mubr.bf16.vlgmr.msra.gmra.mrb[0].mxu1 %v644_v1 }
 0x216   : > { %v744_v3 = vpop.f32.mrb[0].mxu1 }
 0x217   : > { %v745_v4 = vadd.f32 %v744_v3, %v661_v2  ;;  %v967_v5 = vpop.f32.mrb[1].mxu1 }
 0x218   : > { %v747_v6 = vpop.f32.mrb[2].mxu1 }
 0x219   : > { %750 = vst [vmem:[%s212_s22] sm:$0x1] %v745_v4  ;;  %v968_v7 = vpop.f32.mrb[3].mxu1 }
 0x21a   : > { %1065 = shalt.err (!%p1062_p5)
}
 0x21b   : > { %s1066_s9 = scalar_lea.hbm %s1292_s30, 16  ;;  %s1070_s12 = scalar_lea.hbm %s1343_s4, 32 }
 0x21c   : > { %p1067_p6 = scmp.ne.s32.totalorder %s1292_s30, %s1066_s9  ;;  %p1071_p10 = scmp.lt.u32.totalorder %s1292_s30, %s1343_s4 }
 0x21d   : > { %p1072_p11 = scmp.lt.u32.totalorder %s1070_s12, %s1066_s9  ;;  %p1074_p13 = scmp.lt.u32.totalorder %s1066_s9, %s1292_s30 }
 0x21e   : > { %p1068_p7 = pnand %p1067_p6, %p1200_p4 }
 0x21f   : > { %p1073_p12 = por %p1072_p11, %p1071_p10 }
 0x220   : > { %p1069_p9 = pneg %p1068_p7 }
 0x221   : > { %p1075_p0 = por %p1074_p13, %p1073_p12 }
 0x223   : > { %p1076_p1 = pnand %p1075_p0, %p1069_p9 }
 0x225   : > { %1079 = shalt.err (!%p1076_p1)
}
 0x226   : > { %969 = dma.vmem_to_hbm [thread:$0]  (%p1200_p4), %s1294_s24, 16, %s1292_s30, %s752_s5  }
 0x227 PF: > { %p975_p2 = scmp.ge.s32.totalorder %s1130_s20, 2  ;;  %s776_s21 = sand.u32 1, %s1110_s15  }
 0x228   : > { %s777_s22 = scalar_lea.sflag [#allocation4], %s776_s21 }
 0x229   : > { %p972_p3 = pnand %p975_p2, %p1207_p8 }
 0x22b   : > { %1105 = dma.done.wait (!%p972_p3), %s777_s22, 16  }
 0x22c   : > { %1107 = vsyncadd (!%p972_p3), %s777_s22, 4294967280  ;;  %s17_s20 = sadd.s32 1, %s1130_s20   ;;  %s1346_s15 = smov %s1114_s16 }
 0x22d   : > { %p14_p5 = scmp.ge.s32.totalorder %s17_s20, 4   ;;  %s1347_s16 = smov %s1118_s17 }
 0x22e   : > { %s1348_s17 = smov %s1213_s28  ;;  %s1349_s18 = smov %s1126_s19 }
 0x22f   : > { %s1350_s19 = smov %s1352_s23  ;;  %16 = sbr.rel (!%p14_p5) target bundleno = 4 (0x4), region = 79 }
 0x236   :  { %781 = vsyncpa [#allocation4], 1 }
 0x237   :  { %783 = vsyncpa [#allocation4 + $0x1], 1 }

</bundles_post_ra>
